<compile_context>
chip_gen: v5e
topology: v5e:2x2
jax: 0.10.0
libtpu: 0.0.40
codegen_flags: <defaults>
</compile_context>

<pallas_src>
import jax
import jax.numpy as jnp
from jax import lax
from jax.experimental import pallas as pl
from jax.experimental.pallas import tpu as pltpu

TEMPERATURE = 0.07          # NTXentLoss default
NORM_EPS = 1e-12            # F.normalize eps


def _round_up(x, m):
    return ((x + m - 1) // m) * m


def _vmem_capacity_bytes():
    # Per-core VMEM capacity (~128 MiB on v5e/v6e, ~64 MiB per TensorCore on
    # v7x).  Under megacore ("parallel" grid) the resident zn is replicated
    # into each core's private VMEM, so all sizing below is per core.
    try:
        return int(pltpu.get_tpu_info().vmem_capacity_bytes)
    except Exception:                       # older/newer jaxlibs, odd backends
        return 64 * 1024 * 1024             # conservative (v7x per-core) value


def _plan(n, d, budget_bytes):
    """Pick padded row count Np and the square tile TQ (row tile of the sim
    matrix == column-chunk size of the in-kernel LSE loop)."""
    n16 = _round_up(max(n, 2), 16)
    zn_bytes = n16 * d * 2                   # resident bf16 zn (per core)
    if zn_bytes > int(0.8 * budget_bytes):
        # TODO(synk): stream zn column chunks from HBM (BlockSpec over the
        # chunk axis) instead of keeping zn fully resident for huge N*D.
        raise NotImplementedError(
            "embeddings too large for a VMEM-resident zn on this chip")
    # ~6 live f32/i32 [TQ, TQ] slabs per column chunk (sim, exp, col iota,
    # masks/selects) plus the [TQ, D] bf16 lhs/rhs copies.
    avail = max(budget_bytes - zn_bytes - 4096 * d - (1 << 20), 1 << 20)
    tq = int((avail // 24) ** 0.5)
    # Keep >= 2 row tiles whenever the problem is big enough (megacore on
    # v7x); cap at 1024 (step overhead ~0.35us is already negligible there).
    tq = min(tq, 1024, max(16, _round_up(n, 32) // 2))
    if tq >= 128:
        tq = (tq // 128) * 128               # 128-aligned M/N (v5e MXU)
    else:
        tq = max(16, (tq // 16) * 16)        # bf16 sublane packing
    np_ = _round_up(n, tq)
    return np_, tq


def _normalize_kernel(z_ref, zn_ref):
    # Row-wise L2 normalization (F.normalize semantics: x / max(||x||, eps)).
    # Padded rows are exact zeros -> 0 * rsqrt(eps^2) = 0 exactly, which the
    # loss kernel relies on.
    z = z_ref[...]
    ss = jnp.sum(z * z, axis=-1, keepdims=True)
    inv = lax.rsqrt(jnp.maximum(ss, NORM_EPS * NORM_EPS))   # EUP rsqrt
    zn_ref[...] = (z * inv).astype(zn_ref.dtype)            # bf16 for the MXU


def _make_loss_kernel(n_real, batch, tq, num_chunks, inv_temp):
    # Only Python ints/floats are closed over (no captured trace constants).
    def kernel(zn_ref, o_ref):
        i = pl.program_id(0)
        row0 = pl.multiple_of(i * tq, tq)
        lhs = zn_ref[pl.ds(row0, tq), :]                     # [tq, D] bf16
        rows = lax.broadcasted_iota(jnp.int32, (tq, 1), 0) + i * tq

        def chunk(c, carry):
            s_pos_acc, denom_acc = carry
            col0 = pl.multiple_of(c * tq, tq)
            rhs = zn_ref[pl.ds(col0, tq), :]                 # [tq, D] bf16
            # sim = (lhs . rhs^T) / T: MXU bf16 x bf16 -> f32 accumulation,
            # contracting the lane (feature) dim of both operands -- the same
            # A @ B^T form flash-attention uses (no XLU transpose of zn).
            sim = lax.dot_general(
                lhs, rhs,
                dimension_numbers=(((1,), (1,)), ((), ())),
                preferred_element_type=jnp.float32) * inv_temp   # [tq,tq] f32

            cols = lax.broadcasted_iota(jnp.int32, (tq, tq), 1) + col0
            diff = cols - rows                               # col - row
            col_ok = cols < n_real                           # mask padded cols
            is_self = diff == 0
            is_pos = jnp.logical_and(
                jnp.logical_or(diff == batch, diff == -batch), col_ok)

            # Exactly one positive per real row; it lies in exactly one chunk.
            s_pos_acc = s_pos_acc + jnp.sum(
                jnp.where(is_pos, sim, 0.0), axis=1, keepdims=True)

            # Denominator over real columns except self.  Fixed stability
            # shift m = 1/T: cosine sim <= 1 up to bf16 rounding (~1 + 4e-3),
            # so exp arguments stay <= ~0.06 and chunk results simply add.
            p = jnp.exp(sim - inv_temp)                      # f32 exp
            keep = jnp.logical_and(col_ok, jnp.logical_not(is_self))
            denom_acc = denom_acc + jnp.sum(
                jnp.where(keep, p, 0.0), axis=1, keepdims=True)
            return s_pos_acc, denom_acc

        init = (jnp.zeros((tq, 1), jnp.float32),
                jnp.zeros((tq, 1), jnp.float32))
        s_pos, denom = lax.fori_loop(0, num_chunks, chunk, init,
                                     unroll=num_chunks <= 4)

        # -log(num/denom) with num = exp(s_pos - m): no divide, no second exp.
        loss_row = jnp.log(denom) - (s_pos - inv_temp)       # [tq, 1]
        loss_row = jnp.where(rows < n_real, loss_row, 0.0)   # drop padded rows
        o_ref[0] = jnp.sum(loss_row)                         # per-tile partial
    return kernel


def nt_xent_loss(feats1, feats2):
    """JAX/Pallas equivalent of NTXentLoss.forward -> {'T': loss}."""
    b, d = feats1.shape
    n = 2 * b
    cap = _vmem_capacity_bytes()
    budget = int(0.70 * cap)
    vmem_limit = min(int(0.85 * cap), 100 * 1024 * 1024)
    np_, tq = _plan(n, d, budget)
    grid_rows = np_ // tq

    # Concatenate + row-pad only (no lane padding, no [Np, Dp] f32 slab).
    # TODO(synk): feed feats1/feats2 as two kernel inputs to also drop this
    # single O(N*D) concat materialization.
    z = jnp.concatenate([feats1.astype(jnp.float32),
                         feats2.astype(jnp.float32)], axis=0)
    if np_ != n:
        z = jnp.pad(z, ((0, np_ - n), (0, 0)))

    # Kernel 1: row-wise L2 normalize -> bf16 zn (memory-bound; tq-row tiles).
    zn = pl.pallas_call(
        _normalize_kernel,
        out_shape=jax.ShapeDtypeStruct((np_, d), jnp.bfloat16),
        grid=(grid_rows,),
        in_specs=[pl.BlockSpec((tq, d), lambda i: (i, 0))],
        out_specs=pl.BlockSpec((tq, d), lambda i: (i, 0)),
        compiler_params=pltpu.CompilerParams(
            dimension_semantics=("parallel",),
            vmem_limit_bytes=vmem_limit),
    )(z)

    # Kernel 2: row-tiled, column-chunked masked log-sum-exp over the cosine
    # similarity matrix with zn fully resident in VMEM.
    kernel = _make_loss_kernel(n, b, tq, grid_rows, 1.0 / TEMPERATURE)
    partials = pl.pallas_call(
        kernel,
        out_shape=jax.ShapeDtypeStruct((grid_rows,), jnp.float32),
        grid=(grid_rows,),
        in_specs=[pl.BlockSpec(memory_space=pltpu.MemorySpace.VMEM)],
        out_specs=pl.BlockSpec((1,), lambda i: (i,),
                               memory_space=pltpu.MemorySpace.SMEM),
        compiler_params=pltpu.CompilerParams(
            dimension_semantics=("parallel",),
            vmem_limit_bytes=vmem_limit),
        cost_estimate=pl.CostEstimate(
            flops=2 * np_ * np_ * d,
            transcendentals=np_ * np_,
            bytes_accessed=np_ * d * 2 + 4 * grid_rows),
    )(zn)

    loss = jnp.sum(partials) / jnp.float32(n)   # mean over 2B positive pairs
    return {'T': loss}


def _reference(feats1, feats2):
    # Pure-JAX reference (pytorch-metric-learning formulation).  Uses the same
    # bf16 rounding of the normalized embeddings as the kernel's MXU path.
    z = jnp.concatenate([feats1, feats2], axis=0).astype(jnp.float32)
    n = z.shape[0]
    bsz = n // 2
    zn = z / jnp.maximum(jnp.linalg.norm(z, axis=-1, keepdims=True), NORM_EPS)
    zb = zn.astype(jnp.bfloat16)
    sim = jnp.dot(zb, zb.T, preferred_element_type=jnp.float32) / TEMPERATURE
    labels = jnp.concatenate([jnp.arange(bsz), jnp.arange(bsz)])
    eye = jnp.eye(n, dtype=bool)
    pos_mask = (labels[:, None] == labels[None, :]) & (~eye)
    neg_mask = labels[:, None] != labels[None, :]
    neg_inf = float(jnp.finfo(jnp.float32).min)
    s_pos = jnp.sum(jnp.where(pos_mask, sim, 0.0), axis=1, keepdims=True)
    max_neg = jnp.max(jnp.where(neg_mask, sim, neg_inf), axis=1, keepdims=True)
    m = jnp.maximum(s_pos, max_neg)
    num = jnp.exp(s_pos - m)
    den = jnp.sum(jnp.where(neg_mask, jnp.exp(sim - m), 0.0),
                  axis=1, keepdims=True) + num
    return jnp.mean(-jnp.log(num / den))


if __name__ == "__main__":
    key = jax.random.PRNGKey(0)
    k1, k2 = jax.random.split(key)
    B, D = 8, 32
    feats1 = jax.random.normal(k1, (B, D), dtype=jnp.float32)
    feats2 = jax.random.normal(k2, (B, D), dtype=jnp.float32)

    out = nt_xent_loss(feats1, feats2)
    loss = jax.block_until_ready(out['T'])

    ref = jax.block_until_ready(_reference(feats1, feats2))
    assert jnp.allclose(loss, ref, rtol=2e-3, atol=2e-3), (loss, ref)

    print("KERNEL_OK")
</pallas_src>

<mosaic_0001>
module attributes {stable_mosaic.version = 11 : i64} {
  func.func @_normalize_kernel(%arg0: i32, %arg1: memref<16x32xf32, #tpu.memory_space<vmem>>, %arg2: memref<16x32xbf16, #tpu.memory_space<vmem>>) attributes {dimension_semantics = [#tpu.dimension_semantics<parallel>], iteration_bounds = array<i64: 1>, scalar_prefetch = 0 : i64, scratch_operands = 0 : i64, tpu.core_type = #tpu.core_type<tc>, window_params = [{transform_indices = @transform_0, window_bounds = array<i64: 16, 32>}, {transform_indices = @transform_1, window_bounds = array<i64: 16, 32>}]} {
    %c0 = arith.constant 0 : index
    %c0_0 = arith.constant 0 : index
    %0 = vector.load %arg1[%c0, %c0_0] : memref<16x32xf32, #tpu.memory_space<vmem>>, vector<16x32xf32>
    %1 = arith.mulf %0, %0 : vector<16x32xf32>
    %cst = arith.constant dense<0.000000e+00> : vector<16xf32>
    %2 = vector.multi_reduction <add>, %1, %cst [1] : vector<16x32xf32> to vector<16xf32>
    %3 = vector.shape_cast %2 : vector<16xf32> to vector<16x1xf32>
    %cst_1 = arith.constant 1.000000e-24 : f32
    %4 = vector.broadcast %cst_1 : f32 to vector<16x1xf32>
    %5 = arith.maximumf %3, %4 : vector<16x1xf32>
    %6 = math.rsqrt %5 : vector<16x1xf32>
    %7 = vector.broadcast %6 : vector<16x1xf32> to vector<16x32xf32>
    %8 = arith.mulf %0, %7 : vector<16x32xf32>
    %9 = arith.truncf %8 : vector<16x32xf32> to vector<16x32xbf16>
    %c0_2 = arith.constant 0 : index
    %c0_3 = arith.constant 0 : index
    %10 = vector.load %arg2[%c0_2, %c0_3] : memref<16x32xbf16, #tpu.memory_space<vmem>>, vector<16x32xbf16>
    tpu.vector_store %arg2[%c0_2, %c0_3], %9 {strides = array<i32>} : memref<16x32xbf16, #tpu.memory_space<vmem>>, vector<16x32xbf16>,
    return
  }
  func.func @transform_0(%arg0: i32) -> (i32, i32) {
    %c0_i32 = arith.constant 0 : i32
    %c0_i32_0 = arith.constant 0 : i32
    return %arg0, %c0_i32 : i32, i32
  }
  func.func @transform_1(%arg0: i32) -> (i32, i32) {
    %c0_i32 = arith.constant 0 : i32
    %c0_i32_0 = arith.constant 0 : i32
    return %arg0, %c0_i32 : i32, i32
  }
}

</mosaic_0001>

<bundles_post_ra>
// kernel: tpu_custom_call.1
= control target key start
LH: loop header
LB: loop body
LE: loop exit
PB: predicated region body
PF: predicated region fallthrough
CT: control target
= control target key end

     0   :  { %6 = vsyncpa [#allocation3], 0  ;;  %s170_s0 = inlined_call_operand.hbm [shape: f32[16,32], index: 0, kind: input, shape index: {}]   ;;  %s171_s1 = inlined_call_operand.hbm [shape: bf16[16,32], index: 1, kind: output, shape index: {}]  }
   0x1   :  { %7 = vsyncpa [#allocation4], 0  ;;  %s12_s8 = sshll.u32 %s170_s0, 4  ;;  %s146_s9 = smov [#allocation2]   ;;  %s13_s8 = int_to_ptr.hbm [resolvable:$true] %s12_s8 }
   0x2   :  { %s14_s10 = sshll.u32 %s146_s9, 4  ;;  %s147_s11 = smov 128   ;;  %s15_s10 = int_to_ptr.vmem [resolvable:$true] %s14_s10 }
   0x3   :  { %s148_s12 = smov 8  }
   0x4   :  { %20 = dma.hbm_to_vmem [thread:$0]  %s13_s8, 256, %s15_s10, [#allocation3], %s147_s11, %s147_s11, %s148_s12  }
   0x5   :  { %142 = dma.done.wait [#allocation3], 256  }
   0x6   :  { %143 = vsyncadd [#allocation3], 4294967040  ;;  %v25_v0 = vld [vmem:[#allocation2] sm:$0xff]  ;;  %vm29_vm0 = vcmask 261120   ;;  %v26_v2 = vld [vmem:[#allocation2 + $0x8] sm:$0xff]  ;;  %vm62_vm4 = vcmask 257024  }
   0x7   :  { %v27_v1 = vmul.f32 %v25_v0, %v25_v0  ;;  %v28_v4 = vmul.f32 %v26_v2, %v26_v2  ;;  %s149_s0 = smov [#allocation5]   ;;  %s71_s16 = sshll.u32 %s171_s1, 4  ;;  %s72_s16 = int_to_ptr.hbm [resolvable:$true] %s71_s16 }
   0x8   :  { %s69_s13 = sshll.u32 %s149_s0, 4  ;;  %s150_s17 = smov 64   ;;  %s70_s13 = int_to_ptr.vmem [resolvable:$true] %s69_s13 }
   0x9   :  { %v30_v3 = vsel %vm29_vm0, %v27_v1, 0.0  ;;  %v33_v5 = vsel %vm29_vm0, %v28_v4, 0.0  ;;  %s151_s18 = smov 4  }
   0xa   :  { %31 = vadd.xlane.f32.xlu0 %v30_v3 }
  0x12   :  { %34 = vadd.xlane.f32.xlu0 %v33_v5 }
  0x7d   :  { %v32_v6 = vpop.xlane.xlu0 %31 }
  0x7e   :  { %v36_v7 = vmax.f32 %v32_v6, 1e-24 }
  0x80   :  { %90 = vrsqrt.f32 %v36_v7  ;;  %vm44_vm2 = vweird.f32 %v36_v7 }
  0x85   :  { %v35_v8 = vpop.xlane.xlu0 %34 }
  0x86   :  { %v91_v9 = vpop.eup %90  ;;  %v37_v10 = vmax.f32 %v35_v8, 1e-24 }
  0x87   :  { %v39_v11 = vmul.f32 %v91_v9, %v36_v7  ;;  %vm45_vm1 = vweird.f32 %v91_v9 }
  0x88   :  { %92 = vrsqrt.f32 %v37_v10  ;;  %vm46_vm3 = vmor %vm44_vm2, %vm45_vm1  ;;  %vm54_vm6 = vweird.f32 %v37_v10 }
  0x89   :  { %v40_v12 = vmul.f32 %v91_v9, %v39_v11 }
  0x8b   :  { %v41_v13 = vmul.f32 0.5, %v40_v12 }
  0x8d   :  { %v42_v14 = vsub.f32 1.5, %v41_v13 }
  0x8e   :  { %v93_v15 = vpop.eup %92 }
  0x8f   :  { %v43_v16 = vmul.f32 %v91_v9, %v42_v14  ;;  %v49_v17 = vmul.f32 %v93_v15, %v37_v10  ;;  %vm55_vm5 = vweird.f32 %v93_v15 }
  0x90   :  { %vm56_vm7 = vmor %vm54_vm6, %vm55_vm5 }
  0x91   :  { %v47_v18 = vsel %vm46_vm3, %v91_v9, %v43_v16  ;;  %v50_v19 = vmul.f32 %v93_v15, %v49_v17 }
  0x92   :  { %v58_v20 = vmul.f32 %v47_v18, %v25_v0 }
  0x93   :  { %v51_v21 = vmul.f32 0.5, %v50_v19 }
  0x94   :  { %v60_v22 = vpack.c.bf16 %v58_v20, %v58_v20 }
  0x95   :  { %v52_v23 = vsub.f32 1.5, %v51_v21 }
  0x96   :  { %63 = vst.msk [vmem:[#allocation5] sm:$0xf] %vm62_vm4, %v60_v22 }
  0x97   :  { %v53_v24 = vmul.f32 %v93_v15, %v52_v23 }
  0x99   :  { %v57_v25 = vsel %vm56_vm7, %v93_v15, %v53_v24 }
  0x9a   :  { %v59_v26 = vmul.f32 %v57_v25, %v26_v2 }
  0x9c   :  { %v61_v27 = vpack.c.bf16 %v59_v26, %v59_v26 }
  0x9e   :  { %64 = vst.msk [vmem:[#allocation5 + $0x4] sm:$0xf] %vm62_vm4, %v61_v27 }
  0x9f   :  { %77 = dma.vmem_to_hbm [thread:$0]  %s70_s13, 128, %s72_s16, [#allocation4], %s150_s17, %s150_s17, %s151_s18  }
  0xa0   :  { %144 = dma.done.wait [#allocation4], 128  }
  0xa1   :  { %145 = vsyncadd [#allocation4], 4294967168 }
  0xa2   :  { %82 = vsyncpa [#allocation3], 1 }
  0xa3   :  { %83 = vsyncpa [#allocation4], 1 }

</bundles_post_ra>
